<compile_context>
chip_gen: v6e
topology: v6e:2x2x1
jax: 0.10.0
libtpu: 0.0.40
codegen_flags: <defaults>
</compile_context>

<pallas_src>
import numpy as np
import jax
import jax.numpy as jnp
from jax.experimental import pallas as pl
from jax.experimental.pallas import tpu as pltpu


def _sigmoid(x):
    # Explicit form: exp on the EUP + VPU divide (robust Mosaic lowering).
    return 1.0 / (1.0 + jnp.exp(-x))


def _make_time_embed_kernel(res, mid_channels):
    def kernel(t_ref, w1_ref, b1_ref, w2_ref, b2_ref, o_ref):
        t = t_ref[...].astype(jnp.float32)
        # Linear1 + SiLU -- hidden h stays in registers/VMEM (never hits HBM)
        h = jnp.dot(t, w1_ref[...], preferred_element_type=jnp.float32) + b1_ref[...]
        h = h * _sigmoid(h)
        # Linear2 + QuickGELU
        y = jnp.dot(h, w2_ref[...], preferred_element_type=jnp.float32) + b2_ref[...]
        y = y * _sigmoid(1.702 * y)
        if res:
            y = y + float(mid_channels) * t      # requires Cin == Cout
        o_ref[...] = y.astype(o_ref.dtype)

    return kernel


def time_embed_forward(t, w1, b1, w2, b2, *, res=False):
    """t: (B, Cin); w1: (Cin, Cmid); w2: (Cmid, Cout).  Returns (B, Cout)."""
    B, Cin = t.shape
    Cmid = w1.shape[1]
    Cout = w2.shape[1]
    if res and Cin != Cout:
        raise ValueError("res=True requires in_channels == out_channels")

    # Batch tiling: one full-array block when small, else 512-row tiles
    # (multiple of 8 sublanes); padded rows are sliced off afterwards.
    if B <= 512:
        BT, tp = B, t
    else:
        BT = 512
        pad = (-B) % BT
        tp = jnp.pad(t, ((0, pad), (0, 0))) if pad else t
    nb = tp.shape[0] // BT

    kernel = _make_time_embed_kernel(res, Cmid)
    out = pl.pallas_call(
        kernel,
        out_shape=jax.ShapeDtypeStruct((tp.shape[0], Cout), t.dtype),
        grid=(nb,),
        in_specs=[
            pl.BlockSpec((BT, Cin), lambda i: (i, 0)),     # batch tile of t
            pl.BlockSpec((Cin, Cmid), lambda i: (0, 0)),   # W1 (resident)
            pl.BlockSpec((1, Cmid), lambda i: (0, 0)),     # b1
            pl.BlockSpec((Cmid, Cout), lambda i: (0, 0)),  # W2 (resident)
            pl.BlockSpec((1, Cout), lambda i: (0, 0)),     # b2
        ],
        out_specs=pl.BlockSpec((BT, Cout), lambda i: (i, 0)),
        compiler_params=pltpu.CompilerParams(dimension_semantics=("parallel",)),
    )(tp, w1, b1.reshape(1, Cmid), w2, b2.reshape(1, Cout))
    return out[:B]


# ------------------------------------------------------------ pure-JAX ref ---
def ref_forward(t, w1, b1, w2, b2, *, res=False):
    mid_channels = w1.shape[1]
    h = t @ w1 + b1
    h = h * jax.nn.sigmoid(h)            # SiLU
    y = h @ w2 + b2
    y = y * jax.nn.sigmoid(1.702 * y)    # QuickGELU
    if res:
        y = y + float(mid_channels) * t
    return y


if __name__ == "__main__":
    in_channels, out_channels = 4, 4
    mid_channels = (in_channels + out_channels) // 2   # = 4, as in TimeEmbed
    B = 8

    keys = jax.random.split(jax.random.PRNGKey(0), 5)
    w1 = 0.5 * jax.random.normal(keys[0], (in_channels, mid_channels), jnp.float32)
    b1 = 0.5 * jax.random.normal(keys[1], (mid_channels,), jnp.float32)
    w2 = 0.5 * jax.random.normal(keys[2], (mid_channels, out_channels), jnp.float32)
    b2 = 0.5 * jax.random.normal(keys[3], (out_channels,), jnp.float32)
    t = jax.random.normal(keys[4], (B, in_channels), jnp.float32)

    for res in (False, True):
        out = jax.block_until_ready(time_embed_forward(t, w1, b1, w2, b2, res=res))
        ref = ref_forward(t, w1, b1, w2, b2, res=res)
        assert out.shape == (B, out_channels), out.shape
        np.testing.assert_allclose(np.asarray(out), np.asarray(ref),
                                   rtol=1e-4, atol=1e-4)

    print("KERNEL_OK")
</pallas_src>

<mosaic_0001>
module attributes {stable_mosaic.version = 11 : i64} {
  func.func @kernel(%arg0: i32, %arg1: memref<8x4xf32, #tpu.memory_space<vmem>>, %arg2: memref<4x4xf32, #tpu.memory_space<vmem>>, %arg3: memref<1x4xf32, #tpu.memory_space<vmem>>, %arg4: memref<4x4xf32, #tpu.memory_space<vmem>>, %arg5: memref<1x4xf32, #tpu.memory_space<vmem>>, %arg6: memref<8x4xf32, #tpu.memory_space<vmem>>) attributes {dimension_semantics = [#tpu.dimension_semantics<parallel>], iteration_bounds = array<i64: 1>, scalar_prefetch = 0 : i64, scratch_operands = 0 : i64, tpu.core_type = #tpu.core_type<tc>, window_params = [{transform_indices = @transform_0, window_bounds = array<i64: 8, 4>}, {pipeline_mode = #tpu.pipeline_mode<synchronous>, transform_indices = @transform_1, window_bounds = array<i64: 4, 4>}, {pipeline_mode = #tpu.pipeline_mode<synchronous>, transform_indices = @transform_2, window_bounds = array<i64: 1, 4>}, {pipeline_mode = #tpu.pipeline_mode<synchronous>, transform_indices = @transform_3, window_bounds = array<i64: 4, 4>}, {pipeline_mode = #tpu.pipeline_mode<synchronous>, transform_indices = @transform_4, window_bounds = array<i64: 1, 4>}, {transform_indices = @transform_5, window_bounds = array<i64: 8, 4>}]} {
    %c0 = arith.constant 0 : index
    %c0_0 = arith.constant 0 : index
    %0 = vector.load %arg1[%c0, %c0_0] : memref<8x4xf32, #tpu.memory_space<vmem>>, vector<8x4xf32>
    %c0_1 = arith.constant 0 : index
    %c0_2 = arith.constant 0 : index
    %1 = vector.load %arg2[%c0_1, %c0_2] : memref<4x4xf32, #tpu.memory_space<vmem>>, vector<4x4xf32>
    %cst = arith.constant dense<0.000000e+00> : vector<8x4xf32>
    %2 = tpu.matmul %0, %1, %cst {dimension_numbers = #tpu.dot_dimension_numbers<[1], [0], [0], [1], [0, 0, 1, 1], [], []>} : vector<8x4xf32>, vector<4x4xf32>, vector<8x4xf32> -> vector<8x4xf32>
    %c0_3 = arith.constant 0 : index
    %c0_4 = arith.constant 0 : index
    %3 = vector.load %arg3[%c0_3, %c0_4] : memref<1x4xf32, #tpu.memory_space<vmem>>, vector<1x4xf32>
    %4 = vector.broadcast %3 : vector<1x4xf32> to vector<8x4xf32>
    %5 = arith.addf %2, %4 : vector<8x4xf32>
    %cst_5 = arith.constant 0.000000e+00 : f32
    %6 = vector.broadcast %cst_5 : f32 to vector<8x4xf32>
    %7 = arith.subf %6, %5 : vector<8x4xf32>
    %8 = math.exp %7 : vector<8x4xf32>
    %cst_6 = arith.constant 1.000000e+00 : f32
    %9 = vector.broadcast %cst_6 : f32 to vector<8x4xf32>
    %10 = arith.addf %9, %8 : vector<8x4xf32>
    %cst_7 = arith.constant 1.000000e+00 : f32
    %11 = vector.broadcast %cst_7 : f32 to vector<8x4xf32>
    %12 = arith.divf %11, %10 : vector<8x4xf32>
    %13 = arith.mulf %5, %12 : vector<8x4xf32>
    %c0_8 = arith.constant 0 : index
    %c0_9 = arith.constant 0 : index
    %14 = vector.load %arg4[%c0_8, %c0_9] : memref<4x4xf32, #tpu.memory_space<vmem>>, vector<4x4xf32>
    %cst_10 = arith.constant dense<0.000000e+00> : vector<8x4xf32>
    %15 = tpu.matmul %13, %14, %cst_10 {dimension_numbers = #tpu.dot_dimension_numbers<[1], [0], [0], [1], [0, 0, 1, 1], [], []>} : vector<8x4xf32>, vector<4x4xf32>, vector<8x4xf32> -> vector<8x4xf32>
    %c0_11 = arith.constant 0 : index
    %c0_12 = arith.constant 0 : index
    %16 = vector.load %arg5[%c0_11, %c0_12] : memref<1x4xf32, #tpu.memory_space<vmem>>, vector<1x4xf32>
    %17 = vector.broadcast %16 : vector<1x4xf32> to vector<8x4xf32>
    %18 = arith.addf %15, %17 : vector<8x4xf32>
    %cst_13 = arith.constant 1.702000e+00 : f32
    %19 = vector.broadcast %cst_13 : f32 to vector<8x4xf32>
    %20 = arith.mulf %19, %18 : vector<8x4xf32>
    %cst_14 = arith.constant 0.000000e+00 : f32
    %21 = vector.broadcast %cst_14 : f32 to vector<8x4xf32>
    %22 = arith.subf %21, %20 : vector<8x4xf32>
    %23 = math.exp %22 : vector<8x4xf32>
    %cst_15 = arith.constant 1.000000e+00 : f32
    %24 = vector.broadcast %cst_15 : f32 to vector<8x4xf32>
    %25 = arith.addf %24, %23 : vector<8x4xf32>
    %cst_16 = arith.constant 1.000000e+00 : f32
    %26 = vector.broadcast %cst_16 : f32 to vector<8x4xf32>
    %27 = arith.divf %26, %25 : vector<8x4xf32>
    %28 = arith.mulf %18, %27 : vector<8x4xf32>
    %c0_17 = arith.constant 0 : index
    %c0_18 = arith.constant 0 : index
    %29 = vector.load %arg6[%c0_17, %c0_18] : memref<8x4xf32, #tpu.memory_space<vmem>>, vector<8x4xf32>
    tpu.vector_store %arg6[%c0_17, %c0_18], %28 {strides = array<i32>} : memref<8x4xf32, #tpu.memory_space<vmem>>, vector<8x4xf32>,
    return
  }
  func.func @transform_0(%arg0: i32) -> (i32, i32) {
    %c0_i32 = arith.constant 0 : i32
    %c0_i32_0 = arith.constant 0 : i32
    return %arg0, %c0_i32 : i32, i32
  }
  func.func @transform_1(%arg0: i32) -> (i32, i32) {
    %c0_i32 = arith.constant 0 : i32
    %c0_i32_0 = arith.constant 0 : i32
    %c0_i32_1 = arith.constant 0 : i32
    return %c0_i32, %c0_i32_0 : i32, i32
  }
  func.func @transform_2(%arg0: i32) -> (i32, i32) {
    %c0_i32 = arith.constant 0 : i32
    %c0_i32_0 = arith.constant 0 : i32
    %c0_i32_1 = arith.constant 0 : i32
    return %c0_i32, %c0_i32_0 : i32, i32
  }
  func.func @transform_3(%arg0: i32) -> (i32, i32) {
    %c0_i32 = arith.constant 0 : i32
    %c0_i32_0 = arith.constant 0 : i32
    %c0_i32_1 = arith.constant 0 : i32
    return %c0_i32, %c0_i32_0 : i32, i32
  }
  func.func @transform_4(%arg0: i32) -> (i32, i32) {
    %c0_i32 = arith.constant 0 : i32
    %c0_i32_0 = arith.constant 0 : i32
    %c0_i32_1 = arith.constant 0 : i32
    return %c0_i32, %c0_i32_0 : i32, i32
  }
  func.func @transform_5(%arg0: i32) -> (i32, i32) {
    %c0_i32 = arith.constant 0 : i32
    %c0_i32_0 = arith.constant 0 : i32
    return %arg0, %c0_i32 : i32, i32
  }
}

</mosaic_0001>

<bundles_post_ra>
// kernel: tpu_custom_call.1
= control target key start
LH: loop header
LB: loop body
LE: loop exit
PB: predicated region body
PF: predicated region fallthrough
CT: control target
= control target key end

     0   :  { %vm33_vm0 = vcmask 1043456   ;;  %vm29_vm1 = vcmask 31744   ;;  %v241_v0 = vmov 0.0   ;;  %vm242_vm2 = vmmov 0   ;;  %s294_s1 = inlined_call_operand.vmem [shape: f32[4,4], index: 1, kind: input, shape index: {}]   ;;  %s295_s0 = inlined_call_operand.vmem [shape: f32[8,4], index: 0, kind: input, shape index: {}]   ;;  %s296_s3 = inlined_call_operand.vmem [shape: f32[4,4], index: 3, kind: input, shape index: {}]   ;;  %s297_s2 = inlined_call_operand.vmem [shape: f32[1,4], index: 2, kind: input, shape index: {}]   ;;  %s298_s4 = inlined_call_operand.vmem [shape: f32[1,4], index: 4, kind: input, shape index: {}]   ;;  %s299_s5 = inlined_call_operand.vmem [shape: f32[8,4], index: 5, kind: output, shape index: {}]  }
   0x1   :  { %221 = vmatprep.subr.mxu0 %v241_v0  ;;  %v21_v1 = vld [vmem:[%s294_s1] sm:$0xf]  ;;  %223 = vmatprep.mubr.msk.f32.mxu0 %vm242_vm2, %v241_v0 }
   0x2   :  { %v20_v2 = vld [vmem:[%s295_s0] sm:$0xff]  ;;  %222 = vmatpush3.msk.msra.mxu0 %vm33_vm0, %v21_v1  ;;  %226 = vmatprep.subr.mxu1 %v241_v0 }
   0x3   :  { %224 = vmatmul.mubr.msk.f32.vlgmr.msra.gmra.mxu0 %vm29_vm1, %v20_v2  ;;  %228 = vmatprep.mubr.msk.f32.mxu1 %vm242_vm2, %v241_v0  ;;  %v114_v3 = vld [vmem:[%s296_s3] sm:$0xf] }
   0x4   :  { %227 = vmatpush3.msk.msra.mxu1 %vm33_vm0, %v114_v3  ;;  %v211_v4 = vld [vmem:[%s297_s2] ss:$0 sm:$0xff] }
   0x5   :  { %v214_v14 = vld [vmem:[%s298_s4] ss:$0 sm:$0xff] }
  0xc3   :  { %v103_v5 = vpop.f32.mrf.mxu0 }
  0xc4   :  { %v104_v6 = vadd.f32 %v211_v4, %v103_v5 }
  0xc5   :  { %v225_v7 = vpop.f32.mrf.mxu0 }
  0xc6   :  { %v107_v8 = vsub.f32 0.0, %v104_v6 }
  0xc8   :  { %v108_v9 = vmul.f32 1.442695, %v107_v8 }
  0xca   :  { %233 = vpow2.f32 %v108_v9 }
  0xd7   :  { %v234_v10 = vpop.eup %233 }
  0xd8   :  { %v110_v11 = vadd.f32 1.0, %v234_v10 }
  0xda   :  { %235 = vrcp.f32 %v110_v11 }
  0xe7   :  { %v236_v12 = vpop.eup %235 }
  0xe8   :  { %v113_v13 = vmul.f32 %v236_v12, %v104_v6 }
  0xea   :  { %229 = vmatmul.mubr.msk.f32.vlgmr.msra.gmra.mxu1 %vm29_vm1, %v113_v13 }
 0x1aa   :  { %v194_v15 = vpop.f32.mrf.mxu1 }
 0x1ab   :  { %v195_v16 = vadd.f32 %v214_v14, %v194_v15 }
 0x1ac   :  { %v230_v17 = vpop.f32.mrf.mxu1 }
 0x1ad   :  { %v198_v18 = vmul.f32 1.702, %v195_v16 }
 0x1af   :  { %v199_v19 = vsub.f32 0.0, %v198_v18 }
 0x1b1   :  { %v200_v20 = vmul.f32 1.442695, %v199_v19 }
 0x1b3   :  { %237 = vpow2.f32 %v200_v20 }
 0x1c0   :  { %v238_v21 = vpop.eup %237 }
 0x1c1   :  { %v202_v22 = vadd.f32 1.0, %v238_v21 }
 0x1c3   :  { %239 = vrcp.f32 %v202_v22 }
 0x1d0   :  { %v240_v23 = vpop.eup %239 }
 0x1d1   :  { %v205_v24 = vmul.f32 %v240_v23, %v195_v16 }
 0x1d3   :  { %206 = vst.msk [vmem:[%s299_s5] sm:$0xff] %vm29_vm1, %v205_v24 }

</bundles_post_ra>
